<compile_context>
chip_gen: v5e
topology: v5e:2x2
jax: 0.10.0
libtpu: 0.0.40
codegen_flags: <defaults>
</compile_context>

<pallas_src>
import functools

import jax
import jax.numpy as jnp
from jax.experimental import pallas as pl
from jax.experimental.pallas import tpu as pltpu


_LANE = 128
# Total scoped-VMEM we request from the compiler.  48 MiB stays under v7x's
# 64 MiB physical VMEM per TensorCore and is far below v5e/v6e's 128 MiB
# (whose *default* scoped limit of 16/32 MiB must be raised explicitly).
_VMEM_LIMIT_BYTES = 48 * 1024 * 1024
# Budget the double-buffered in/out blocks are sized against (headroom left
# for weights, scratch and compiler temporaries under the 48 MiB limit).
_BLOCK_BUDGET_BYTES = 32 * 1024 * 1024
# Below this block size the per-grid-step overhead dominates, so we prefer
# packing more batch elements into one block over having more grid steps.
_TARGET_BLOCK_BYTES = 8 * 1024 * 1024


def _round_up(x, m):
    return ((x + m - 1) // m) * m


# ---------------------------------------------------------------------------
# Fused single-pass kernel: pool + two 1x1 convs + gate + multiply for a block
# of B_blk images.  Weights are pre-transposed so the matmuls contract over C
# without any in-kernel transpose.
# ---------------------------------------------------------------------------
def _fused_kernel(x_ref, w1t_ref, w2t_ref, o_ref, *, inv_hw):
    # x_ref : (B_blk, C, HW_pad)   native dtype
    # w1t_ref: (C, hidden)
    # w2t_ref: (hidden, C)
    # o_ref : (B_blk, C, HW_pad)
    x = x_ref[...]                                           # keep native dtype

    # Global average pool: sum over lanes with f32 accumulation (no full-tile
    # f32 copy of x) and divide by the TRUE HW so lane padding (zeros) does
    # not bias the mean.
    pooled = jnp.sum(x, axis=-1, dtype=jnp.float32) * inv_hw  # (B_blk, C)

    # 1x1 conv #1: (B_blk, C) @ (C, hidden).  FLOPs are negligible; the kernel
    # is HBM-bound, so we deliberately leave these as plain small matmuls.
    h = jnp.dot(pooled, w1t_ref[...], preferred_element_type=jnp.float32)
    h = jnp.where(h > 0, h, 0.1 * h)                          # LeakyReLU(0.1)

    # 1x1 conv #2: (B_blk, hidden) @ (hidden, C)
    g = jnp.dot(h, w2t_ref[...], preferred_element_type=jnp.float32)

    # Sigmoid gate: exp on the EUP, reciprocal kept exact to preserve parity
    # with the reference (gate is only B_blk*C elements -> cost is noise).
    gate = pl.reciprocal(1.0 + jnp.exp(-g), approx=False)     # (B_blk, C) f32

    # Broadcast multiply in the input dtype (keeps bf16 tiles bf16).
    o_ref[...] = (gate[:, :, None].astype(x.dtype) * x).astype(o_ref.dtype)


# ---------------------------------------------------------------------------
# Two-pass fallback, pass 2: gate * x, tiled over (batch, HW tiles).
# ---------------------------------------------------------------------------
def _gated_mul_kernel(gate_ref, x_ref, o_ref):
    # gate_ref: (1, C, 1) f32 ; x_ref/o_ref: (1, C, T)
    x = x_ref[...]
    o_ref[...] = (gate_ref[...].astype(x.dtype) * x).astype(o_ref.dtype)


def channel_attention(x, w1, w2, *, force_two_pass=False):
    """ChannelAttention forward.

    x : (B, C, H, W)
    w1: (C//ratio, C)   PyTorch conv_c1.weight with the trailing (1,1) squeezed
    w2: (C, C//ratio)   PyTorch conv_c2.weight with the trailing (1,1) squeezed
    Returns (B, C, H, W).
    """
    B, C, H, W = x.shape
    hidden = w1.shape[0]
    HW = H * W
    HW_pad = _round_up(HW, _LANE)
    itemsize = jnp.dtype(x.dtype).itemsize
    w_itemsize = jnp.dtype(w1.dtype).itemsize

    x_flat = x.reshape(B, C, HW)
    inv_hw = 1.0 / float(HW)

    # Advisory cost hint: this custom call is bandwidth-heavy.
    cost = pl.CostEstimate(
        flops=int(B * (4 * C * hidden + C * HW)),
        transcendentals=int(B * C),
        bytes_accessed=int(2 * B * C * HW * itemsize + 2 * C * hidden * w_itemsize),
    )

    # ---- path selection: fused single pass vs. gate-precompute + tiled mul --
    per_image_block_bytes = C * HW_pad * itemsize
    weight_ws_bytes = 2 * (2 * C * hidden * w_itemsize)      # both weights, 2x buffered
    divisors = [d for d in range(1, B + 1) if B % d == 0]
    fitting = [d for d in divisors
               if 4 * d * per_image_block_bytes + weight_ws_bytes <= _BLOCK_BUDGET_BYTES]

    if fitting and not force_two_pass:
        # ------------------ fused single-pass path --------------------------
        # Largest batch-block whose block stays <= target size (fatter steps
        # amortize per-step overhead); if even one image exceeds the target
        # (but still fits the budget) fall back to one image per step.
        # Note: on v7x a grid of 1 step forgoes megacore sharding, but for
        # blocks this small the per-step overhead is the bigger cost.
        preferred = [d for d in fitting
                     if d * per_image_block_bytes <= _TARGET_BLOCK_BYTES]
        b_blk = max(preferred) if preferred else min(fitting)

        if HW_pad != HW:
            x_in = jnp.pad(x_flat, ((0, 0), (0, 0), (0, HW_pad - HW)))
        else:
            x_in = x_flat
        w1t = w1.T                                            # (C, hidden)
        w2t = w2.T                                            # (hidden, C)

        out_p = pl.pallas_call(
            functools.partial(_fused_kernel, inv_hw=inv_hw),
            out_shape=jax.ShapeDtypeStruct((B, C, HW_pad), x.dtype),
            grid_spec=pltpu.PrefetchScalarGridSpec(
                num_scalar_prefetch=0,
                grid=(B // b_blk,),
                in_specs=[
                    pl.BlockSpec((b_blk, C, HW_pad), lambda i: (i, 0, 0)),
                    pl.BlockSpec((C, hidden), lambda i: (0, 0)),
                    pl.BlockSpec((hidden, C), lambda i: (0, 0)),
                ],
                out_specs=pl.BlockSpec((b_blk, C, HW_pad), lambda i: (i, 0, 0)),
            ),
            compiler_params=pltpu.CompilerParams(
                dimension_semantics=("parallel",),
                vmem_limit_bytes=_VMEM_LIMIT_BYTES),
            cost_estimate=cost,
        )(x_in, w1t, w2t)

        out = out_p[:, :, :HW] if HW_pad != HW else out_p
        return out.reshape(B, C, H, W)

    # ---------------------- two-pass fallback path ---------------------------
    # Pass 1: gate on the pooled features.  Tiny (B*C work) -> plain XLA; it
    # costs one extra streaming read of x but keeps every Pallas block inside
    # the VMEM budget for arbitrarily large feature maps.
    pooled = jnp.mean(x, axis=(2, 3), dtype=jnp.float32)       # (B, C)
    h = pooled @ w1.astype(jnp.float32).T                      # (B, hidden)
    h = jnp.where(h > 0, h, 0.1 * h)                           # LeakyReLU(0.1)
    g = h @ w2.astype(jnp.float32).T                           # (B, C)
    gate = jax.nn.sigmoid(g).reshape(B, C, 1)                  # (B, C, 1) f32

    # Pass 2: tiled gate * x in Pallas.  Lane tile T is the largest multiple
    # of 128 whose double-buffered in+out blocks fit the budget.
    max_t = (_BLOCK_BUDGET_BYTES - 4 * C * 4) // max(1, 4 * C * itemsize)
    T = max(_LANE, (max_t // _LANE) * _LANE)
    T = min(T, HW_pad)
    HW_pad2 = _round_up(HW, T)
    if HW_pad2 != HW:
        x_in = jnp.pad(x_flat, ((0, 0), (0, 0), (0, HW_pad2 - HW)))
    else:
        x_in = x_flat

    out_p = pl.pallas_call(
        _gated_mul_kernel,
        out_shape=jax.ShapeDtypeStruct((B, C, HW_pad2), x.dtype),
        grid_spec=pltpu.PrefetchScalarGridSpec(
            num_scalar_prefetch=0,
            grid=(B, HW_pad2 // T),
            in_specs=[
                pl.BlockSpec((1, C, 1), lambda b, t: (b, 0, 0)),
                pl.BlockSpec((1, C, T), lambda b, t: (b, 0, t)),
            ],
            out_specs=pl.BlockSpec((1, C, T), lambda b, t: (b, 0, t)),
        ),
        compiler_params=pltpu.CompilerParams(
            dimension_semantics=("parallel", "parallel"),
            vmem_limit_bytes=_VMEM_LIMIT_BYTES),
        cost_estimate=cost,
    )(gate, x_in)

    out = out_p[:, :, :HW] if HW_pad2 != HW else out_p
    return out.reshape(B, C, H, W)


def _reference(x, w1, w2):
    pooled = jnp.mean(x, axis=(2, 3))                          # (B, C)
    h = pooled @ w1.T                                          # (B, C//r)
    h = jnp.where(h > 0, h, 0.1 * h)
    g = h @ w2.T                                               # (B, C)
    gate = jax.nn.sigmoid(g)[:, :, None, None]                 # (B, C, 1, 1)
    return gate * x


if __name__ == "__main__":
    key = jax.random.PRNGKey(0)
    kx, k1, k2, kx2 = jax.random.split(key, 4)

    B, nf, ratio = 2, 64, 16
    hidden = nf // ratio

    # Deterministic synthetic weights (PyTorch conv weight shapes with the
    # trailing (1,1) spatial dims squeezed out).
    w1 = jax.random.normal(k1, (hidden, nf), dtype=jnp.float32) * 0.1
    w2 = jax.random.normal(k2, (nf, hidden), dtype=jnp.float32) * 0.1

    # Case 1: HW a multiple of 128 -> fused single-pass path, batched block.
    x = jax.random.normal(kx, (B, nf, 16, 16), dtype=jnp.float32)
    out = jax.block_until_ready(channel_attention(x, w1, w2))
    ref = _reference(x, w1, w2)
    assert out.shape == x.shape
    assert jnp.allclose(out, ref, atol=1e-5, rtol=1e-5), "fused path mismatch"

    # Case 2: HW not a multiple of 128 -> exercises lane padding + true-HW mean.
    x_odd = jax.random.normal(kx2, (B, nf, 10, 10), dtype=jnp.float32)
    out_odd = jax.block_until_ready(channel_attention(x_odd, w1, w2))
    ref_odd = _reference(x_odd, w1, w2)
    assert jnp.allclose(out_odd, ref_odd, atol=1e-5, rtol=1e-5), "padded path mismatch"

    # Case 3: force the large-feature-map fallback (gate precompute + tiled mul).
    out_tp = jax.block_until_ready(channel_attention(x, w1, w2, force_two_pass=True))
    assert jnp.allclose(out_tp, ref, atol=1e-5, rtol=1e-5), "two-pass path mismatch"

    print("KERNEL_OK")
</pallas_src>

<mosaic_0001>
module attributes {stable_mosaic.version = 11 : i64} {
  func.func @_fused_kernel(%arg0: i32, %arg1: memref<2x64x256xf32, #tpu.memory_space<vmem>>, %arg2: memref<64x4xf32, #tpu.memory_space<vmem>>, %arg3: memref<4x64xf32, #tpu.memory_space<vmem>>, %arg4: memref<2x64x256xf32, #tpu.memory_space<vmem>>) attributes {dimension_semantics = [#tpu.dimension_semantics<parallel>], iteration_bounds = array<i64: 1>, scalar_prefetch = 0 : i64, scratch_operands = 0 : i64, tpu.core_type = #tpu.core_type<tc>, window_params = [{transform_indices = @transform_0, window_bounds = array<i64: 2, 64, 256>}, {pipeline_mode = #tpu.pipeline_mode<synchronous>, transform_indices = @transform_1, window_bounds = array<i64: 64, 4>}, {pipeline_mode = #tpu.pipeline_mode<synchronous>, transform_indices = @transform_2, window_bounds = array<i64: 4, 64>}, {transform_indices = @transform_3, window_bounds = array<i64: 2, 64, 256>}]} {
    %c0 = arith.constant 0 : index
    %c0_0 = arith.constant 0 : index
    %c0_1 = arith.constant 0 : index
    %0 = vector.load %arg1[%c0, %c0_0, %c0_1] : memref<2x64x256xf32, #tpu.memory_space<vmem>>, vector<2x64x256xf32>
    %cst = arith.constant dense<0.000000e+00> : vector<2x64xf32>
    %1 = vector.multi_reduction <add>, %0, %cst [2] : vector<2x64x256xf32> to vector<2x64xf32>
    %cst_2 = arith.constant 3.906250e-03 : f32
    %2 = vector.broadcast %cst_2 : f32 to vector<2x64xf32>
    %3 = arith.mulf %1, %2 : vector<2x64xf32>
    %c0_3 = arith.constant 0 : index
    %c0_4 = arith.constant 0 : index
    %4 = vector.load %arg2[%c0_3, %c0_4] : memref<64x4xf32, #tpu.memory_space<vmem>>, vector<64x4xf32>
    %cst_5 = arith.constant dense<0.000000e+00> : vector<2x4xf32>
    %5 = tpu.matmul %3, %4, %cst_5 {dimension_numbers = #tpu.dot_dimension_numbers<[1], [0], [0], [1], [0, 0, 1, 1], [], []>} : vector<2x64xf32>, vector<64x4xf32>, vector<2x4xf32> -> vector<2x4xf32>
    %cst_6 = arith.constant 0.000000e+00 : f32
    %6 = vector.broadcast %cst_6 : f32 to vector<2x4xf32>
    %7 = arith.cmpf ogt, %5, %6 : vector<2x4xf32>
    %cst_7 = arith.constant 1.000000e-01 : f32
    %8 = vector.broadcast %cst_7 : f32 to vector<2x4xf32>
    %9 = arith.mulf %8, %5 : vector<2x4xf32>
    %10 = arith.select %7, %5, %9 : vector<2x4xi1>, vector<2x4xf32>
    %c0_8 = arith.constant 0 : index
    %c0_9 = arith.constant 0 : index
    %11 = vector.load %arg3[%c0_8, %c0_9] : memref<4x64xf32, #tpu.memory_space<vmem>>, vector<4x64xf32>
    %cst_10 = arith.constant dense<0.000000e+00> : vector<2x64xf32>
    %12 = tpu.matmul %10, %11, %cst_10 {dimension_numbers = #tpu.dot_dimension_numbers<[1], [0], [0], [1], [0, 0, 1, 1], [], []>} : vector<2x4xf32>, vector<4x64xf32>, vector<2x64xf32> -> vector<2x64xf32>
    %cst_11 = arith.constant 0.000000e+00 : f32
    %13 = vector.broadcast %cst_11 : f32 to vector<2x64xf32>
    %14 = arith.subf %13, %12 : vector<2x64xf32>
    %15 = math.exp %14 : vector<2x64xf32>
    %cst_12 = arith.constant 1.000000e+00 : f32
    %16 = vector.broadcast %cst_12 : f32 to vector<2x64xf32>
    %17 = arith.addf %16, %15 : vector<2x64xf32>
    %18 = tpu.reciprocal %17 : vector<2x64xf32> -> vector<2x64xf32>
    %19 = vector.shape_cast %18 : vector<2x64xf32> to vector<2x64x1xf32>
    %20 = vector.broadcast %19 : vector<2x64x1xf32> to vector<2x64x256xf32>
    %21 = arith.mulf %20, %0 : vector<2x64x256xf32>
    %c0_13 = arith.constant 0 : index
    %c0_14 = arith.constant 0 : index
    %c0_15 = arith.constant 0 : index
    %22 = vector.load %arg4[%c0_13, %c0_14, %c0_15] : memref<2x64x256xf32, #tpu.memory_space<vmem>>, vector<2x64x256xf32>
    tpu.vector_store %arg4[%c0_13, %c0_14, %c0_15], %21 {strides = array<i32>} : memref<2x64x256xf32, #tpu.memory_space<vmem>>, vector<2x64x256xf32>,
    return
  }
  func.func @transform_0(%arg0: i32) -> (i32, i32, i32) {
    %c0_i32 = arith.constant 0 : i32
    %c0_i32_0 = arith.constant 0 : i32
    %c0_i32_1 = arith.constant 0 : i32
    return %arg0, %c0_i32, %c0_i32_0 : i32, i32, i32
  }
  func.func @transform_1(%arg0: i32) -> (i32, i32) {
    %c0_i32 = arith.constant 0 : i32
    %c0_i32_0 = arith.constant 0 : i32
    %c0_i32_1 = arith.constant 0 : i32
    return %c0_i32, %c0_i32_0 : i32, i32
  }
  func.func @transform_2(%arg0: i32) -> (i32, i32) {
    %c0_i32 = arith.constant 0 : i32
    %c0_i32_0 = arith.constant 0 : i32
    %c0_i32_1 = arith.constant 0 : i32
    return %c0_i32, %c0_i32_0 : i32, i32
  }
  func.func @transform_3(%arg0: i32) -> (i32, i32, i32) {
    %c0_i32 = arith.constant 0 : i32
    %c0_i32_0 = arith.constant 0 : i32
    %c0_i32_1 = arith.constant 0 : i32
    return %arg0, %c0_i32, %c0_i32_0 : i32, i32, i32
  }
}

</mosaic_0001>

<bundles_post_ra>
// kernel: tpu_custom_call.1
= control target key start
LH: loop header
LB: loop body
LE: loop exit
PB: predicated region body
PF: predicated region fallthrough
CT: control target
= control target key end

     0   :  { %8 = vsyncpa [#allocation3], 0  ;;  %s734_s0 = inlined_call_operand.hbm [shape: f32[2,64,256], index: 0, kind: input, shape index: {}]   ;;  %s735_s1 = inlined_call_operand.vmem [shape: f32[64,4], index: 1, kind: input, shape index: {}]   ;;  %s736_s2 = inlined_call_operand.vmem [shape: f32[4,64], index: 2, kind: input, shape index: {}]   ;;  %s737_s3 = inlined_call_operand.hbm [shape: f32[2,64,256], index: 3, kind: output, shape index: {}]  }
   0x1   :  { %9 = vsyncpa [#allocation4], 0  ;;  %s14_s14 = sshll.u32 %s734_s0, 4  ;;  %s533_s15 = smov [#allocation2]   ;;  %s15_s14 = int_to_ptr.hbm [resolvable:$true] %s14_s14 }
   0x2   :  { %s16_s16 = sshll.u32 %s533_s15, 4  ;;  %s534_s17 = smov 256   ;;  %s17_s16 = int_to_ptr.vmem [resolvable:$true] %s16_s16 }
   0x3   :  { %s535_s18 = smov 16  }
   0x4   :  { %22 = dma.hbm_to_vmem [thread:$0]  %s15_s14, 4096, %s17_s16, [#allocation3], %s534_s17, %s534_s17, %s535_s18  }
   0x5   :  { %529 = dma.done.wait [#allocation3], 4096  }
   0x6   :  { %530 = vsyncadd [#allocation3], 4294963200  ;;  %v563_v0 = vld [vmem:[#allocation2 + $0x80] sm:$0xff]  ;;  %v565_v1 = vld [vmem:[#allocation2 + $0x88] sm:$0xff]  ;;  %vm156_vm0 = vcmask 130112   ;;  %vm160_vm1 = vcmask 195712  }
   0x7   :  { %v567_v2 = vld [vmem:[#allocation2] sm:$0xff]  ;;  %v87_v3 = vadd.f32 %v565_v1, %v563_v0  ;;  %v571_v4 = vld [vmem:[#allocation2 + $0x8] sm:$0xff]  ;;  %v581_v9 = vld [vmem:[#allocation2 + $0x90] sm:$0xff]  ;;  %vm164_vm2 = vcmask 261312   ;;  %vm168_vm3 = vcmask 326912   ;;  %vm172_vm4 = vcmask 392512  }
   0x8   :  { %v573_v5 = vld [vmem:[#allocation2 + $0x20] sm:$0xff]  ;;  %v575_v6 = vld [vmem:[#allocation2 + $0x28] sm:$0xff]  ;;  %v63_v7 = vadd.f32 %v571_v4, %v567_v2  ;;  %v583_v10 = vld [vmem:[#allocation2 + $0x98] sm:$0xff]  ;;  %vm176_vm5 = vcmask 458112   ;;  %vm180_vm6 = vcmask 523712   ;;  %vm197_vm7 = vcmask 1041409  }
   0x9   :  { %v69_v8 = vadd.f32 %v575_v6, %v573_v5  ;;  %88 = vadd.xlane.f32.xlu1 %v87_v3  ;;  %v585_v11 = vld [vmem:[#allocation2 + $0x10] sm:$0xff]  ;;  %v587_v12 = vld [vmem:[#allocation2 + $0x18] sm:$0xff]  ;;  %v589_v13 = vld [vmem:[#allocation2 + $0xa0] sm:$0xff]  ;;  %v90_v15 = vadd.f32 %v583_v10, %v581_v9  ;;  %vm199_vm8 = vcmask 523264   ;;  %vm230_vm9 = vcmask 1043456   ;;  %s440_s11 = sshll.u32 %s737_s3, 4  ;;  %s441_s11 = int_to_ptr.hbm [resolvable:$true] %s440_s11 }
   0xa   :  { %64 = vadd.xlane.f32.xlu0 %v63_v7  ;;  %v591_v14 = vld [vmem:[#allocation2 + $0xa8] sm:$0xff]  ;;  %v66_v16 = vadd.f32 %v587_v12, %v585_v11  ;;  %v599_v18 = vld [vmem:[#allocation2 + $0xb0] sm:$0xff]  ;;  %v601_v19 = vld [vmem:[#allocation2 + $0xb8] sm:$0xff]  ;;  %v738_v7 = vlaneseq  ;;  %vm226_vm11 = vcmask 31744  }
   0xb   :  { %70 = vadd.xlane.f32.xlu2 %v69_v8  ;;  %v93_v17 = vadd.f32 %v591_v14, %v589_v13  ;;  %v603_v20 = vld [vmem:[#allocation2 + $0x30] sm:$0xff]  ;;  %v605_v21 = vld [vmem:[#allocation2 + $0x38] sm:$0xff]  ;;  %v607_v22 = vld [vmem:[#allocation2 + $0x40] sm:$0xff]  ;;  %v96_v24 = vadd.f32 %v601_v19, %v599_v18 }
   0xc   :  { %v609_v23 = vld [vmem:[#allocation2 + $0x48] sm:$0xff]  ;;  %v72_v25 = vadd.f32 %v605_v21, %v603_v20  ;;  %v617_v27 = vld [vmem:[#allocation2 + $0x50] sm:$0xff]  ;;  %v619_v28 = vld [vmem:[#allocation2 + $0x58] sm:$0xff]  ;;  %v152_v8 = vand.u32 127, %v738_v7 }
   0xd   :  { %v75_v26 = vadd.f32 %v609_v23, %v607_v22  ;;  %v621_v29 = vld [vmem:[#allocation2 + $0xc0] sm:$0xff]  ;;  %v623_v30 = vld [vmem:[#allocation2 + $0xc8] sm:$0xff]  ;;  %v625_v31 = vld [vmem:[#allocation2 + $0xd0] sm:$0xff]  ;;  %v78_v33 = vadd.f32 %v619_v28, %v617_v27 }
   0xe   :  { %741 = vst [vmem:[#allocation8_spill] sm:$0xff] %v625_v31  ;;  %v627_v32 = vld [vmem:[#allocation2 + $0xd8] sm:$0xff]  ;;  %v99_v34 = vadd.f32 %v623_v30, %v621_v29  ;;  %v635_v36 = vld [vmem:[#allocation2 + $0xe0] sm:$0xff]  ;;  %v637_v37 = vld [vmem:[#allocation2 + $0xe8] sm:$0xff] }
   0xf   :  { %742 = vst [vmem:[#allocation9_spill] sm:$0xff] %v627_v32  ;;  %v102_v35 = vadd.f32 %v627_v32, %v625_v31  ;;  %v639_v38 = vld [vmem:[#allocation2 + $0x60] sm:$0xff]  ;;  %v641_v39 = vld [vmem:[#allocation2 + $0x68] sm:$0xff]  ;;  %v643_v40 = vld [vmem:[#allocation2 + $0x70] sm:$0xff]  ;;  %v105_v42 = vadd.f32 %v637_v37, %v635_v36 }
  0x10   :  { %v645_v41 = vld [vmem:[#allocation2 + $0x78] sm:$0xff]  ;;  %v81_v43 = vadd.f32 %v641_v39, %v639_v38  ;;  %v653_v45 = vld [vmem:[#allocation2 + $0xf0] sm:$0xff]  ;;  %v132_v53 = vld [vmem:[%s735_s1 + $0x28] sm:$0xff] }
  0x11   :  { %91 = vadd.xlane.f32.xlu1 %v90_v15  ;;  %v84_v44 = vadd.f32 %v645_v41, %v643_v40  ;;  %v655_v46 = vld [vmem:[#allocation2 + $0xf8] sm:$0xff]  ;;  %v133_v52 = vld [vmem:[%s735_s1 + $0x30] sm:$0xff]  ;;  %v131_v54 = vld [vmem:[%s735_s1 + $0x20] sm:$0xff] }
  0x12   :  { %67 = vadd.xlane.f32.xlu0 %v66_v16  ;;  %v108_v47 = vadd.f32 %v655_v46, %v653_v45  ;;  %v134_v48 = vld [vmem:[%s735_s1 + $0x38] sm:$0xff]  ;;  %v129_v59 = vld [vmem:[%s735_s1 + $0x10] sm:$0xff]  ;;  %v128_v60 = vld [vmem:[%s735_s1 + $0x8] sm:$0xff] }
  0x13   :  { %94 = vadd.xlane.f32.xlu2 %v93_v17  ;;  %210 = vmatpush.msra.mxu0 %v134_v48  ;;  %v130_v55 = vld [vmem:[%s735_s1 + $0x18] sm:$0xff]  ;;  %v127_v61 = vld [vmem:[%s735_s1] sm:$0xff] }
  0x15   :  { %211 = vmatpush.msra.mxu0 %v133_v52 }
  0x17   :  { %212 = vmatpush.msra.mxu0 %v132_v53 }
  0x19   :  { %97 = vadd.xlane.f32.xlu1 %v96_v24  ;;  %213 = vmatpush.msra.mxu0 %v131_v54  ;;  %v154_v24 = vadd.s32 4294967288, %v152_v8 }
  0x1a   :  { %73 = vadd.xlane.f32.xlu0 %v72_v25 }
  0x1b   :  { %76 = vadd.xlane.f32.xlu2 %v75_v26  ;;  %214 = vmatpush.msra.mxu0 %v130_v55 }
  0x1d   :  { %215 = vmatpush.msra.mxu0 %v129_v59 }
  0x1f   :  { %216 = vmatpush.msra.mxu0 %v128_v60  ;;  %v166_v60 = vadd.s32 4294967264, %v152_v8 }
  0x21   :  { %79 = vadd.xlane.f32.xlu1 %v78_v33  ;;  %217 = vmatpush.msra.mxu0 %v127_v61 }
  0x22   :  { %100 = vadd.xlane.f32.xlu0 %v99_v34 }
  0x23   :  { %103 = vadd.xlane.f32.xlu2 %v102_v35  ;;  %v158_v35 = vadd.s32 4294967280, %v152_v8 }
  0x29   :  { %106 = vadd.xlane.f32.xlu1 %v105_v42 }
  0x2a   :  { %82 = vadd.xlane.f32.xlu0 %v81_v43 }
  0x2b   :  { %85 = vadd.xlane.f32.xlu2 %v84_v44  ;;  %v162_v44 = vadd.s32 4294967272, %v152_v8 }
  0x32   :  { %109 = vadd.xlane.f32.xlu0 %v108_v47 }
  0x7c   :  { %v89_v49 = vpop.xlane.xlu1 %88 }
  0x7d   :  { %v65_v50 = vpop.xlane.xlu0 %64  ;;  %v119_v26 = vmul.f32 0.00390625, %v89_v49 }
  0x7e   :  { %v71_v51 = vpop.xlane.xlu2 %70  ;;  %v111_v33 = vmul.f32 0.00390625, %v65_v50 }
  0x7f   :  { %v113_v42 = vmul.f32 0.00390625, %v71_v51  ;;  %v182_v52 = vperm.slane %v119_v26, %v152_v8 }
  0x80   :  { %v153_v53 = vperm.slane %v111_v33, %v152_v8 }
  0x81   :  { %v159_v59 = vperm.slane %v113_v42, %v158_v35 }
  0x84   :  { %v92_v56 = vpop.xlane.xlu1 %91 }
  0x85   :  { %v68_v57 = vpop.xlane.xlu0 %67  ;;  %v120_v34 = vmul.f32 0.00390625, %v92_v56  ;;  %v170_v56 = vadd.s32 4294967256, %v152_v8 }
  0x86   :  { %v95_v58 = vpop.xlane.xlu2 %94  ;;  %v112_v25 = vmul.f32 0.00390625, %v68_v57 }
  0x87   :  { %v121_v48 = vmul.f32 0.00390625, %v95_v58  ;;  %v183_v54 = vperm.slane %v120_v34, %v154_v24 }
  0x88   :  { %v155_v43 = vperm.slane %v112_v25, %v154_v24 }
  0x89   :  { %v185_v32 = vperm.slane %v121_v48, %v158_v35  ;;  %v184_v26 = vsel %vm156_vm0, %v183_v54, %v182_v52 }
  0x8a   :  { %v157_v49 = vsel %vm156_vm0, %v155_v43, %v153_v53 }
  0x8b   :  { %v186_v35 = vsel %vm160_vm1, %v185_v32, %v184_v26 }
  0x8c   :  { %v98_v62 = vpop.xlane.xlu1 %97 }
  0x8d   :  { %v74_v63 = vpop.xlane.xlu0 %73  ;;  %v122_v55 = vmul.f32 0.00390625, %v98_v62 }
  0x8e   :  { %v77_v3 = vpop.xlane.xlu2 %76  ;;  %v114_v47 = vmul.f32 0.00390625, %v74_v63  ;;  %v174_v63 = vadd.s32 4294967248, %v152_v8 }
  0x8f   :  { %v115_v61 = vmul.f32 0.00390625, %v77_v3  ;;  %v187_v24 = vperm.slane %v122_v55, %v162_v44  ;;  %v161_v3 = vsel %vm160_vm1, %v159_v59, %v157_v49 }
  0x90   :  { %v163_v50 = vperm.slane %v114_v47, %v162_v44 }
  0x91   :  { %v188_v53 = vsel %vm164_vm2, %v187_v24, %v186_v35 }
  0x92   :  { %v165_v42 = vsel %vm164_vm2, %v163_v50, %v161_v3 }
  0x94   :  { %v80_v15 = vpop.xlane.xlu1 %79 }
  0x95   :  { %v101_v16 = vpop.xlane.xlu0 %100  ;;  %v116_v51 = vmul.f32 0.00390625, %v80_v15  ;;  %v178_v15 = vadd.s32 4294967240, %v152_v8 }
  0x96   :  { %v104_v17 = vpop.xlane.xlu2 %103  ;;  %v123_v7 = vmul.f32 0.00390625, %v101_v16  ;;  %v167_v16 = vperm.slane %v115_v61, %v166_v60 }
  0x97   :  { %v124_v62 = vmul.f32 0.00390625, %v104_v17  ;;  %v171_v43 = vperm.slane %v116_v51, %v170_v56 }
  0x98   :  { %v189_v33 = vperm.slane %v123_v7, %v166_v60  ;;  %v169_v17 = vsel %vm168_vm3, %v167_v16, %v165_v42 }
  0x99   :  { %v191_v52 = vperm.slane %v124_v62, %v170_v56  ;;  %v173_v55 = vsel %vm172_vm4, %v171_v43, %v169_v17  ;;  %v225_v56 = vld [vmem:[%s736_s2] sm:$0xf]  ;;  %s536_s2 = smov [#allocation5]  }
  0x9a   :  { %v190_v44 = vsel %vm168_vm3, %v189_v33, %v188_v53  ;;  %454 = vmatpush.msk.msra.mxu1 %vm230_vm9, %v225_v56  ;;  %s438_s8 = sshll.u32 %s536_s2, 4  ;;  %s439_s8 = int_to_ptr.vmem [resolvable:$true] %s438_s8 }
  0x9b   :  { %v192_v8 = vsel %vm172_vm4, %v191_v52, %v190_v44 }
  0x9c   :  { %v107_v25 = vpop.xlane.xlu1 %106 }
  0x9d   :  { %v83_v57 = vpop.xlane.xlu0 %82  ;;  %v125_v34 = vmul.f32 0.00390625, %v107_v25 }
  0x9e   :  { %v117_v31 = vmul.f32 0.00390625, %v83_v57  ;;  %v86_v58 = vpop.xlane.xlu2 %85 }
  0x9f   :  { %v118_v47 = vmul.f32 0.00390625, %v86_v58  ;;  %v193_v54 = vperm.slane %v125_v34, %v174_v63  ;;  %v743_v58 = vlaneseq }
  0xa0   :  { %v175_v48 = vperm.slane %v117_v31, %v174_v63 }
  0xa1   :  { %v179_v59 = vperm.slane %v118_v47, %v178_v15  ;;  %v194_v32 = vsel %vm176_vm5, %v193_v54, %v192_v8  ;;  %v274_v26 = vshrl.u32 %v743_v58, 7 }
  0xa2   :  { %v177_v61 = vsel %vm176_vm5, %v175_v48, %v173_v55 }
  0xa3   :  { %v181_v31 = vsel %vm180_vm6, %v179_v59, %v177_v61  ;;  %460 = vset.pattern.permute.xlu1 %v274_v26  ;;  %v287_v24 = vadd.s32 16, %v274_v26  ;;  %v281_v62 = vadd.s32 8, %v274_v26  ;;  %v293_v55 = vadd.s32 24, %v274_v26 }
  0xa4   :  { %v299_v59 = vadd.s32 32, %v274_v26  ;;  %v311_v61 = vadd.s32 48, %v274_v26  ;;  %v305_v8 = vadd.s32 40, %v274_v26 }
  0xa5   :  { %v110_v7 = vpop.xlane.xlu0 %109  ;;  %462 = vset.pattern.permute.xlu0 %v287_v24  ;;  %461 = vset.pattern.permute.xlu2 %v281_v62 }
  0xa6   :  { %v126_v60 = vmul.f32 0.00390625, %v110_v7 }
  0xa8   :  { %v195_v57 = vperm.slane %v126_v60, %v178_v15 }
  0xaa   :  { %v196_v49 = vsel %vm180_vm6, %v195_v57, %v194_v32  ;;  %v317_v57 = vadd.s32 56, %v274_v26 }
  0xab   :  { %v198_v50 = vsel %vm197_vm7, %v196_v49, %v181_v31 }
  0xac   :  { %453 = vmatmul.msk.f32.vlgmr.msra.gmra.mxu0 %vm199_vm8, %v198_v50 }
 0x129   :  { %v219_v51 = vpop.f32.mrf.mxu0 }
 0x12a   :  { %vm222_vm10 = vcmp.gt.f32.partialorder %v219_v51, 0.0  ;;  %v223_v25 = vmul.f32 0.1, %v219_v51 }
 0x12c   :  { %v224_v63 = vsel %vm222_vm10, %v219_v51, %v223_v25 }
 0x12d   :  { %455 = vmatmul.msk.f32.vlgmr.msra.gmra.mxu1 %vm226_vm11, %v224_v63 }
 0x1aa   :  { %v251_v3 = vpop.f32.mrf.mxu1 }
 0x1ab   :  { %v254_v16 = vsub.f32 0.0, %v251_v3 }
 0x1ad   :  { %v255_v33 = vmul.f32 1.442695, %v254_v16 }
 0x1af   :  { %477 = vpow2.f32 %v255_v33 }
 0x1b5   :  { %v478_v34 = vpop.eup %477 }
 0x1b6   :  { %v257_v42 = vadd.f32 1.0, %v478_v34 }
 0x1b8   :  { %479 = vrcp.f32 %v257_v42  ;;  %v269_v35 = vand.u32 2147483648, %v257_v42  ;;  %v267_v53 = vand.u32 2147483647, %v257_v42  ;;  %vm263_vm13 = vweird.f32 %v257_v42 }
 0x1ba   :  { %v270_v17 = vor.u32 1.1754944e-38, %v269_v35  ;;  %vm268_vm15 = vcmp.eq.f32.partialorder %v267_v53, 8.507059e+37 }
 0x1be   :  { %v480_v43 = vpop.eup %479 }
 0x1bf   :  { %v259_v15 = vmul.f32 %v480_v43, %v257_v42  ;;  %vm264_vm12 = vweird.f32 %v480_v43 }
 0x1c0   :  { %vm265_vm14 = vmor %vm263_vm13, %vm264_vm12 }
 0x1c1   :  { %v260_v47 = vsub.f32 1.0, %v259_v15 }
 0x1c3   :  { %v261_v48 = vmul.f32 %v480_v43, %v260_v47 }
 0x1c5   :  { %v262_v52 = vadd.f32 %v480_v43, %v261_v48  ;;  %v745_v48 = vld [vmem:[#allocation9_spill] sm:$0xff] }
 0x1c7   :  { %v266_v44 = vsel %vm265_vm14, %v480_v43, %v262_v52 }
 0x1c8   :  { %v271_v54 = vsel %vm268_vm15, %v270_v17, %v266_v44 }
 0x1c9   :  { %v272_v7 = vperm.slane %v271_v54, 0  ;;  %v321_v60 = vperm.slane %v271_v54, 1 }
 0x1cb   :  { %289 = vperm.xlu0 %462, %v272_v7   ;;  %283 = vperm.xlu2 %461, %v272_v7  }
 0x1cc   :  { %277 = vperm.xlu1 %460, %v272_v7  }
 0x1d3   :  { %469 = vset.pattern.permute.xlu0 %v281_v62  ;;  %463 = vset.pattern.permute.xlu2 %v293_v55 }
 0x1d4   :  { %464 = vset.pattern.permute.xlu1 %v299_v59 }
 0x1db   :  { %332 = vperm.xlu0 %469, %v321_v60   ;;  %295 = vperm.xlu2 %463, %v272_v7  }
 0x1dc   :  { %301 = vperm.xlu1 %464, %v272_v7  }
 0x1e3   :  { %474 = vset.pattern.permute.xlu0 %v311_v61  ;;  %465 = vset.pattern.permute.xlu2 %v305_v8 }
 0x1e4   :  { %466 = vset.pattern.permute.xlu1 %v311_v61 }
 0x1eb   :  { %362 = vperm.xlu0 %474, %v321_v60   ;;  %307 = vperm.xlu2 %465, %v272_v7  }
 0x1ec   :  { %313 = vperm.xlu1 %466, %v272_v7  }
 0x1f3   :  { %467 = vset.pattern.permute.xlu2 %v317_v57  ;;  %476 = vset.pattern.permute.xlu0 %v317_v57 }
 0x1f4   :  { %468 = vset.pattern.permute.xlu1 %v274_v26 }
 0x1fb   :  { %319 = vperm.xlu2 %467, %v272_v7  }
 0x1fc   :  { %326 = vperm.xlu1 %468, %v321_v60  }
 0x203   :  { %470 = vset.pattern.permute.xlu2 %v287_v24 }
 0x204   :  { %471 = vset.pattern.permute.xlu1 %v293_v55 }
 0x20b   :  { %338 = vperm.xlu2 %470, %v321_v60  }
 0x20c   :  { %344 = vperm.xlu1 %471, %v321_v60  }
 0x213   :  { %472 = vset.pattern.permute.xlu2 %v299_v59 }
 0x214   :  { %473 = vset.pattern.permute.xlu1 %v305_v8 }
 0x21b   :  { %350 = vperm.xlu2 %472, %v321_v60  }
 0x21c   :  { %356 = vperm.xlu1 %473, %v321_v60  }
 0x223   :  { %475 = vset.pattern.permute.xlu2 %v317_v57 }
 0x225   :  { %v284_v32 = vpop.permute.xlu2 %283 }
 0x226   :  { %v372_v31 = vmul.f32 %v284_v32, %v585_v11  ;;  %v373_v49 = vmul.f32 %v284_v32, %v587_v12 }
 0x228   :  { %404 = vst [vmem:[#allocation5 + $0x10] sm:$0xff] %v372_v31 }
 0x229   :  { %405 = vst [vmem:[#allocation5 + $0x18] sm:$0xff] %v373_v49 }
 0x22b   :  { %368 = vperm.xlu2 %475, %v321_v60  }
 0x235   :  { %v296_v50 = vpop.permute.xlu2 %295 }
 0x236   :  { %v376_v56 = vmul.f32 %v296_v50, %v603_v20  ;;  %v377_v51 = vmul.f32 %v296_v50, %v605_v21 }
 0x238   :  { %408 = vst [vmem:[#allocation5 + $0x30] sm:$0xff] %v376_v56 }
 0x239   :  { %409 = vst [vmem:[#allocation5 + $0x38] sm:$0xff] %v377_v51 }
 0x23d   :  { %v290_v25 = vpop.permute.xlu0 %289 }
 0x23e   :  { %v374_v63 = vmul.f32 %v290_v25, %v573_v5  ;;  %v375_v58 = vmul.f32 %v290_v25, %v575_v6  ;;  %v278_v26 = vpop.permute.xlu1 %277 }
 0x23f   :  { %v370_v11 = vmul.f32 %v278_v26, %v567_v2  ;;  %v371_v12 = vmul.f32 %v278_v26, %v571_v4 }
 0x240   :  { %406 = vst [vmem:[#allocation5 + $0x20] sm:$0xff] %v374_v63 }
 0x241   :  { %407 = vst [vmem:[#allocation5 + $0x28] sm:$0xff] %v375_v58 }
 0x242   :  { %402 = vst [vmem:[#allocation5] sm:$0xff] %v370_v11 }
 0x243   :  { %403 = vst [vmem:[#allocation5 + $0x8] sm:$0xff] %v371_v12 }
 0x245   :  { %v308_v24 = vpop.permute.xlu2 %307 }
 0x246   :  { %v380_v20 = vmul.f32 %v308_v24, %v617_v27  ;;  %v381_v21 = vmul.f32 %v308_v24, %v619_v28 }
 0x248   :  { %412 = vst [vmem:[#allocation5 + $0x50] sm:$0xff] %v380_v20 }
 0x249   :  { %413 = vst [vmem:[#allocation5 + $0x58] sm:$0xff] %v381_v21 }
 0x24d   :  { %v333_v62 = vpop.permute.xlu0 %332 }
 0x24e   :  { %v388_v5 = vmul.f32 %v333_v62, %v581_v9  ;;  %v389_v6 = vmul.f32 %v333_v62, %v583_v10  ;;  %v302_v3 = vpop.permute.xlu1 %301 }
 0x24f   :  { %v378_v2 = vmul.f32 %v302_v3, %v607_v22  ;;  %v379_v4 = vmul.f32 %v302_v3, %v609_v23 }
 0x250   :  { %420 = vst [vmem:[#allocation5 + $0x90] sm:$0xff] %v388_v5 }
 0x251   :  { %421 = vst [vmem:[#allocation5 + $0x98] sm:$0xff] %v389_v6 }
 0x252   :  { %410 = vst [vmem:[#allocation5 + $0x40] sm:$0xff] %v378_v2 }
 0x253   :  { %411 = vst [vmem:[#allocation5 + $0x48] sm:$0xff] %v379_v4 }
 0x255   :  { %v320_v16 = vpop.permute.xlu2 %319 }
 0x256   :  { %v384_v27 = vmul.f32 %v320_v16, %v643_v40  ;;  %v385_v28 = vmul.f32 %v320_v16, %v645_v41 }
 0x258   :  { %416 = vst [vmem:[#allocation5 + $0x70] sm:$0xff] %v384_v27 }
 0x259   :  { %417 = vst [vmem:[#allocation5 + $0x78] sm:$0xff] %v385_v28 }
 0x25d   :  { %v363_v33 = vpop.permute.xlu0 %362 }
 0x25e   :  { %v398_v9 = vmul.f32 %v363_v33, %v635_v36  ;;  %v399_v10 = vmul.f32 %v363_v33, %v637_v37  ;;  %v314_v34 = vpop.permute.xlu1 %313 }
 0x25f   :  { %v382_v22 = vmul.f32 %v314_v34, %v639_v38  ;;  %v383_v23 = vmul.f32 %v314_v34, %v641_v39 }
 0x260   :  { %430 = vst [vmem:[#allocation5 + $0xe0] sm:$0xff] %v398_v9 }
 0x261   :  { %431 = vst [vmem:[#allocation5 + $0xe8] sm:$0xff] %v399_v10 }
 0x262   :  { %414 = vst [vmem:[#allocation5 + $0x60] sm:$0xff] %v382_v22 }
 0x263   :  { %415 = vst [vmem:[#allocation5 + $0x68] sm:$0xff] %v383_v23 }
 0x265   :  { %v339_v42 = vpop.permute.xlu2 %338 }
 0x266   :  { %v390_v40 = vmul.f32 %v339_v42, %v589_v13  ;;  %v391_v41 = vmul.f32 %v339_v42, %v591_v14 }
 0x268   :  { %422 = vst [vmem:[#allocation5 + $0xa0] sm:$0xff] %v390_v40 }
 0x269   :  { %423 = vst [vmem:[#allocation5 + $0xa8] sm:$0xff] %v391_v41 }
 0x26e   :  { %v327_v43 = vpop.permute.xlu1 %326 }
 0x26f   :  { %v386_v36 = vmul.f32 %v327_v43, %v563_v0  ;;  %v387_v37 = vmul.f32 %v327_v43, %v565_v1 }
 0x271   :  { %418 = vst [vmem:[#allocation5 + $0x80] sm:$0xff] %v386_v36 }
 0x272   :  { %419 = vst [vmem:[#allocation5 + $0x88] sm:$0xff] %v387_v37 }
 0x275   :  { %v351_v38 = vpop.permute.xlu2 %350 }
 0x276   :  { %v394_v39 = vmul.f32 %v351_v38, %v621_v29  ;;  %v395_v15 = vmul.f32 %v351_v38, %v623_v30  ;;  %v744_v30 = vld [vmem:[#allocation8_spill] sm:$0xff] }
 0x278   :  { %426 = vst [vmem:[#allocation5 + $0xc0] sm:$0xff] %v394_v39 }
 0x279   :  { %427 = vst [vmem:[#allocation5 + $0xc8] sm:$0xff] %v395_v15 }
 0x27e   :  { %v345_v47 = vpop.permute.xlu1 %344 }
 0x27f   :  { %v392_v13 = vmul.f32 %v345_v47, %v599_v18  ;;  %v393_v14 = vmul.f32 %v345_v47, %v601_v19 }
 0x281   :  { %424 = vst [vmem:[#allocation5 + $0xb0] sm:$0xff] %v392_v13 }
 0x282   :  { %425 = vst [vmem:[#allocation5 + $0xb8] sm:$0xff] %v393_v14 }
 0x285   :  { %v369_v35 = vpop.permute.xlu2 %368 }
 0x286   :  { %v400_v0 = vmul.f32 %v369_v35, %v653_v45  ;;  %v401_v1 = vmul.f32 %v369_v35, %v655_v46 }
 0x288   :  { %432 = vst [vmem:[#allocation5 + $0xf0] sm:$0xff] %v400_v0 }
 0x289   :  { %433 = vst [vmem:[#allocation5 + $0xf8] sm:$0xff] %v401_v1 }
 0x28e   :  { %v357_v29 = vpop.permute.xlu1 %356 }
 0x28f   :  { %v396_v18 = vmul.f32 %v357_v29, %v744_v30  ;;  %v397_v19 = vmul.f32 %v357_v29, %v745_v48 }
 0x291   :  { %428 = vst [vmem:[#allocation5 + $0xd0] sm:$0xff] %v396_v18 }
 0x292   :  { %429 = vst [vmem:[#allocation5 + $0xd8] sm:$0xff] %v397_v19 }
 0x293   :  { %446 = dma.vmem_to_hbm [thread:$0]  %s439_s8, 4096, %s441_s11, [#allocation4], %s534_s17, %s534_s17, %s535_s18  }
 0x294   :  { %531 = dma.done.wait [#allocation4], 4096  }
 0x295   :  { %532 = vsyncadd [#allocation4], 4294963200 }
 0x296   :  { %451 = vsyncpa [#allocation3], 1 }
 0x297   :  { %452 = vsyncpa [#allocation4], 1 }

</bundles_post_ra>
